<compile_context>
chip_gen: v7x
topology: tpu7x:2x2x1
jax: 0.10.0
libtpu: 0.0.40
codegen_flags: <defaults>
</compile_context>

<pallas_src>
import functools

import jax
import jax.numpy as jnp
from jax import lax
from jax.experimental import pallas as pl
from jax.experimental.pallas import tpu as pltpu

# PyTorch F.pairwise_distance default eps (added to the difference before the norm).
_PAIRWISE_EPS = 1e-6

_OUT_SUBLANES = 8
_OUT_LANES = 128
_LANE = 128


def _round_up(x, m):
    return ((x + m - 1) // m) * m


def _sublane_multiple(dtype):
    # 8 rows for 4-byte, 16 for 2-byte (bf16), 32 for 1-byte element types.
    return max(8, 32 // jnp.dtype(dtype).itemsize)


def _tpu_vmem_and_cores():
    """Best-effort trace-time hardware query: (physical VMEM bytes, #TensorCores).

    Defaults are conservative (128 MiB, 1 TensorCore) so a failed query only
    costs performance, never correctness or compilation.
    """
    vmem_bytes = 128 * 1024 * 1024
    num_cores = 1
    try:
        info = pltpu.get_tpu_info()
        v = getattr(info, "vmem_capacity_bytes", None)
        if v:
            vmem_bytes = int(v)
        for attr in ("num_cores", "num_tensorcores", "tensorcore_count", "core_count"):
            c = getattr(info, attr, None)
            if c:
                num_cores = int(c)
                break
    except Exception:
        pass
    return vmem_bytes, max(1, num_cores)


def _pick_block_rows(dim, itemsize, sub, vmem_cap_bytes):
    """Largest batch tile such that 3 input streams x 2 pipeline buffers use
    ~half of physical VMEM (capped), accounting for 128-lane padding of D."""
    padded_row_bytes = _round_up(dim, _LANE) * itemsize
    # v5e/v6e: 128 MiB VMEM -> 48 MiB for inputs (8 MiB per buffer).
    # v7x:      64 MiB VMEM -> 32 MiB for inputs (~5.3 MiB per buffer).
    input_budget = min(vmem_cap_bytes // 2, 48 * 1024 * 1024)
    per_buffer = input_budget // 6          # 3 inputs x 2 pipeline buffers
    tb = per_buffer // padded_row_bytes
    tb = max(sub, (int(tb) // sub) * sub)
    return tb


def _triplet_loss_kernel(a_ref, p_ref, n_ref, out_ref, *,
                         margin, batch, block_rows, tiles_per_split):
    c = pl.program_id(0)   # batch split (one per TensorCore when CORE_PARALLEL)
    t = pl.program_id(1)   # batch tile within the split (reduction axis)

    # Zero this split's resident partial-sum block at the start of its pass.
    @pl.when(t == 0)
    def _():
        out_ref[...] = jnp.zeros_like(out_ref)

    # Cast AFTER load: bf16 inputs halve HBM traffic, math stays f32.
    a = a_ref[...].astype(jnp.float32)
    p = p_ref[...].astype(jnp.float32)
    n = n_ref[...].astype(jnp.float32)

    # torch.nn.functional.pairwise_distance semantics: eps is added to the
    # difference before the L2 norm.  Square-sum on VPU + XLU lane reduce (no
    # MXU) — the kernel is HBM-bound anyway.
    dpos = a - p + _PAIRWISE_EPS
    dneg = a - n + _PAIRWISE_EPS
    pos_dist = jnp.sqrt(jnp.sum(dpos * dpos, axis=-1, keepdims=True))  # (TB, 1)
    neg_dist = jnp.sqrt(jnp.sum(dneg * dneg, axis=-1, keepdims=True))  # (TB, 1)
    loss = jnp.maximum(pos_dist - neg_dist + margin, 0.0)              # (TB, 1)

    # Global tile index (unclamped), and whether any of this tile's rows fall
    # past the true batch (ragged last tile / clamped overflow tile of an
    # uneven split).  Interior tiles skip the mask entirely.
    g = c * tiles_per_split + t
    needs_mask = (g + 1) * block_rows > batch

    @pl.when(needs_mask)
    def _():
        row_ids = g * block_rows + lax.broadcasted_iota(
            jnp.int32, (block_rows, 1), 0)
        # NOTE: must stay a select (not multiply-by-mask): out-of-bounds rows
        # may hold garbage that produces Inf/NaN before masking.
        masked = jnp.where(row_ids < batch, loss, 0.0)
        out_ref[...] += jnp.sum(masked, keepdims=True)

    @pl.when(jnp.logical_not(needs_mask))
    def _():
        # The (1, 1) tile-sum broadcasts across the aligned (8, 128) block.
        out_ref[...] += jnp.sum(loss, keepdims=True)


def triplet_loss(anchor, positive, negative, margin=1.0, *,
                 block_rows=None, num_cores=None):
    """Pallas TPU forward pass of the PyTorch `Loss` (triplet margin) module.

    anchor/positive/negative: (B, D) float arrays (f32 or bf16).
    Returns scalar f32 = mean(relu(||a-p+eps||_2 - ||a-n+eps||_2 + margin)).
    """
    assert anchor.shape == positive.shape == negative.shape
    assert anchor.dtype == positive.dtype == negative.dtype
    B, D = anchor.shape
    itemsize = jnp.dtype(anchor.dtype).itemsize
    sub = _sublane_multiple(anchor.dtype)

    vmem_cap, detected_cores = _tpu_vmem_and_cores()
    if num_cores is None:
        num_cores = detected_cores
    num_cores = max(1, min(int(num_cores), 2))

    if block_rows is None:
        block_rows = _pick_block_rows(D, itemsize, sub, vmem_cap)
    block_rows = max(sub, (int(block_rows) // sub) * sub)
    if block_rows >= B:
        block_rows = B  # single full-dim tile is always layout-legal

    num_tiles = pl.cdiv(B, block_rows)
    # Split the batch across TensorCores only when the chip actually has 2 TCs
    # (v7x); single-TC chips (v5e/v6e) keep a single reduction axis with no
    # overflow-tile re-DMA and no per-step index clamp.
    n_splits = num_cores if (num_cores > 1 and num_tiles >= num_cores) else 1
    tiles_per_split = pl.cdiv(num_tiles, n_splits)

    if n_splits == 1:
        def in_index(c, t):
            return (t, 0)
    else:
        def in_index(c, t):
            # Clamp overflow tiles (uneven split) onto the last real tile; their
            # rows are masked to zero inside the kernel.
            g = jnp.minimum(c * tiles_per_split + t, num_tiles - 1)
            return (g, 0)

    kernel = functools.partial(
        _triplet_loss_kernel,
        margin=float(margin),
        batch=B,
        block_rows=block_rows,
        tiles_per_split=tiles_per_split,
    )

    # Scoped-VMEM limit matching the enlarged tiles (lane-padded), with slack
    # for the output block(s) and compiler internals, bounded by physical VMEM.
    padded_row_bytes = _round_up(D, _LANE) * itemsize
    input_bytes = 6 * block_rows * padded_row_bytes          # 3 streams x 2 bufs
    out_bytes = 2 * (_OUT_SUBLANES * n_splits) * _OUT_LANES * 4
    needed = input_bytes + out_bytes + (4 << 20)
    vmem_limit = int(min(max(needed, 32 << 20), (vmem_cap * 3) // 4))

    lead_sem = pltpu.CORE_PARALLEL if n_splits > 1 else pltpu.ARBITRARY
    # NOTE: input pipeline depth is left at the default double-buffering; raise
    # via pipeline_mode=pl.Buffered(3) only if a v7x profile still shows DMA
    # gaps at step boundaries after the tile-size fix.
    partials = pl.pallas_call(
        kernel,
        out_shape=jax.ShapeDtypeStruct(
            (_OUT_SUBLANES * n_splits, _OUT_LANES), jnp.float32),
        grid_spec=pltpu.PrefetchScalarGridSpec(
            num_scalar_prefetch=0,
            grid=(n_splits, tiles_per_split),
            in_specs=[
                pl.BlockSpec((block_rows, D), in_index),
                pl.BlockSpec((block_rows, D), in_index),
                pl.BlockSpec((block_rows, D), in_index),
            ],
            out_specs=pl.BlockSpec((_OUT_SUBLANES, _OUT_LANES),
                                   lambda c, t: (c, 0)),
        ),
        compiler_params=pltpu.CompilerParams(
            dimension_semantics=(lead_sem, pltpu.ARBITRARY),
            vmem_limit_bytes=vmem_limit),
    )(anchor, positive, negative)

    # Each split's partial sum is replicated across its (8, 128) block; take one
    # element per split, combine across splits, and apply the mean's divide once
    # with the true batch size.
    return jnp.sum(partials[::_OUT_SUBLANES, 0]) * jnp.float32(1.0 / B)


def _reference_triplet_loss(anchor, positive, negative, margin=1.0):
    # Pure-JAX reference mirroring the PyTorch module.
    a = anchor.astype(jnp.float32)
    p = positive.astype(jnp.float32)
    n = negative.astype(jnp.float32)
    pos = jnp.sqrt(jnp.sum((a - p + _PAIRWISE_EPS) ** 2, axis=-1))
    neg = jnp.sqrt(jnp.sum((a - n + _PAIRWISE_EPS) ** 2, axis=-1))
    return jnp.mean(jnp.maximum(pos - neg + margin, 0.0))


if __name__ == "__main__":
    key = jax.random.PRNGKey(0)

    # (batch, dim, dtype, block_rows) — small shapes; a small explicit tile size
    # keeps the grid multi-tile so the pipelined / masked / unmasked paths run.
    cases = [
        (32, 128, jnp.float32, 8),      # even tile count
        (30, 64, jnp.float32, 8),       # ragged last tile (row masking)
        (24, 128, jnp.float32, 8),      # odd tile count
        (32, 128, jnp.bfloat16, 8),     # bf16 inputs (rounded to 16-row tiles)
        (4, 32, jnp.float32, None),     # tiny batch, auto tile = full block
    ]
    for i, (B, D, dtype, tb) in enumerate(cases):
        k1, k2, k3 = jax.random.split(jax.random.fold_in(key, i), 3)
        anchor = jax.random.normal(k1, (B, D), dtype=jnp.float32).astype(dtype)
        positive = jax.random.normal(k2, (B, D), dtype=jnp.float32).astype(dtype)
        negative = jax.random.normal(k3, (B, D), dtype=jnp.float32).astype(dtype)

        loss = triplet_loss(anchor, positive, negative, margin=1.0,
                            block_rows=tb)
        loss = jax.block_until_ready(loss)

        ref = _reference_triplet_loss(anchor, positive, negative, margin=1.0)
        assert jnp.allclose(loss, ref, rtol=1e-5, atol=1e-5), (
            B, D, dtype, loss, ref)

    print("KERNEL_OK")
</pallas_src>

<mosaic_0001>
module attributes {stable_mosaic.version = 11 : i64} {
  func.func @_triplet_loss_kernel(%arg0: i32, %arg1: i32, %arg2: memref<8x128xf32, #tpu.memory_space<vmem>>, %arg3: memref<8x128xf32, #tpu.memory_space<vmem>>, %arg4: memref<8x128xf32, #tpu.memory_space<vmem>>, %arg5: memref<8x128xf32, #tpu.memory_space<vmem>>) attributes {dimension_semantics = [#tpu.dimension_semantics<arbitrary>, #tpu.dimension_semantics<arbitrary>], iteration_bounds = array<i64: 1, 4>, scalar_prefetch = 0 : i64, scratch_operands = 0 : i64, tpu.core_type = #tpu.core_type<tc>, window_params = [{transform_indices = @transform_0, window_bounds = array<i64: 8, 128>}, {transform_indices = @transform_1, window_bounds = array<i64: 8, 128>}, {transform_indices = @transform_2, window_bounds = array<i64: 8, 128>}, {transform_indices = @transform_3, window_bounds = array<i64: 8, 128>}]} {
    %c0_i32 = arith.constant 0 : i32
    %0 = arith.cmpi eq, %arg1, %c0_i32 : i32
    %1 = arith.extui %0 : i1 to i32
    %c0_i32_0 = arith.constant 0 : i32
    %2 = arith.cmpi ne, %1, %c0_i32_0 : i32
    scf.if %2 {
      %cst_13 = arith.constant 0.000000e+00 : f32
      %35 = vector.broadcast %cst_13 : f32 to vector<8x128xf32>
      %c0_14 = arith.constant 0 : index
      %c0_15 = arith.constant 0 : index
      %36 = vector.load %arg5[%c0_14, %c0_15] : memref<8x128xf32, #tpu.memory_space<vmem>>, vector<8x128xf32>
      tpu.vector_store %arg5[%c0_14, %c0_15], %35 {strides = array<i32>} : memref<8x128xf32, #tpu.memory_space<vmem>>, vector<8x128xf32>,
    } else {
    }
    %c0 = arith.constant 0 : index
    %c0_1 = arith.constant 0 : index
    %3 = vector.load %arg2[%c0, %c0_1] : memref<8x128xf32, #tpu.memory_space<vmem>>, vector<8x128xf32>
    %c0_2 = arith.constant 0 : index
    %c0_3 = arith.constant 0 : index
    %4 = vector.load %arg3[%c0_2, %c0_3] : memref<8x128xf32, #tpu.memory_space<vmem>>, vector<8x128xf32>
    %c0_4 = arith.constant 0 : index
    %c0_5 = arith.constant 0 : index
    %5 = vector.load %arg4[%c0_4, %c0_5] : memref<8x128xf32, #tpu.memory_space<vmem>>, vector<8x128xf32>
    %6 = arith.subf %3, %4 : vector<8x128xf32>
    %cst = arith.constant 9.99999997E-7 : f32
    %7 = vector.broadcast %cst : f32 to vector<8x128xf32>
    %8 = arith.addf %6, %7 : vector<8x128xf32>
    %9 = arith.subf %3, %5 : vector<8x128xf32>
    %cst_6 = arith.constant 9.99999997E-7 : f32
    %10 = vector.broadcast %cst_6 : f32 to vector<8x128xf32>
    %11 = arith.addf %9, %10 : vector<8x128xf32>
    %12 = arith.mulf %8, %8 : vector<8x128xf32>
    %cst_7 = arith.constant dense<0.000000e+00> : vector<8xf32>
    %13 = vector.multi_reduction <add>, %12, %cst_7 [1] : vector<8x128xf32> to vector<8xf32>
    %14 = vector.shape_cast %13 : vector<8xf32> to vector<8x1xf32>
    %15 = math.sqrt %14 : vector<8x1xf32>
    %16 = arith.mulf %11, %11 : vector<8x128xf32>
    %cst_8 = arith.constant dense<0.000000e+00> : vector<8xf32>
    %17 = vector.multi_reduction <add>, %16, %cst_8 [1] : vector<8x128xf32> to vector<8xf32>
    %18 = vector.shape_cast %17 : vector<8xf32> to vector<8x1xf32>
    %19 = math.sqrt %18 : vector<8x1xf32>
    %20 = arith.subf %15, %19 : vector<8x1xf32>
    %cst_9 = arith.constant 1.000000e+00 : f32
    %21 = vector.broadcast %cst_9 : f32 to vector<8x1xf32>
    %22 = arith.addf %20, %21 : vector<8x1xf32>
    %cst_10 = arith.constant 0.000000e+00 : f32
    %23 = vector.broadcast %cst_10 : f32 to vector<8x1xf32>
    %24 = arith.maximumf %22, %23 : vector<8x1xf32>
    %c4_i32 = arith.constant 4 : i32
    %25 = arith.muli %arg0, %c4_i32 : i32
    %26 = arith.addi %25, %arg1 : i32
    %c1_i32 = arith.constant 1 : i32
    %27 = arith.addi %26, %c1_i32 : i32
    %c8_i32 = arith.constant 8 : i32
    %28 = arith.muli %27, %c8_i32 : i32
    %c32_i32 = arith.constant 32 : i32
    %29 = arith.cmpi sgt, %28, %c32_i32 : i32
    %30 = arith.extui %29 : i1 to i32
    %c0_i32_11 = arith.constant 0 : i32
    %31 = arith.cmpi ne, %30, %c0_i32_11 : i32
    scf.if %31 {
      %c8_i32_13 = arith.constant 8 : i32
      %35 = arith.muli %26, %c8_i32_13 : i32
      %36 = tpu.iota {dimensions = array<i32: 0>} : vector<8x1xi32>
      %37 = vector.broadcast %35 : i32 to vector<8x1xi32>
      %38 = arith.addi %37, %36 : vector<8x1xi32>
      %c32_i32_14 = arith.constant 32 : i32
      %39 = vector.broadcast %c32_i32_14 : i32 to vector<8x1xi32>
      %40 = arith.cmpi slt, %38, %39 : vector<8x1xi32>
      %cst_15 = arith.constant 0.000000e+00 : f32
      %41 = vector.broadcast %cst_15 : f32 to vector<8x1xf32>
      %42 = arith.select %40, %24, %41 : vector<8x1xi1>, vector<8x1xf32>
      %c0_16 = arith.constant 0 : index
      %c0_17 = arith.constant 0 : index
      %43 = vector.load %arg5[%c0_16, %c0_17] : memref<8x128xf32, #tpu.memory_space<vmem>>, vector<8x128xf32>
      %44 = vector.shape_cast %42 : vector<8x1xf32> to vector<1x8x1xf32>
      %cst_18 = arith.constant dense<0.000000e+00> : vector<1xf32>
      %45 = vector.multi_reduction <add>, %44, %cst_18 [1, 2] : vector<1x8x1xf32> to vector<1xf32>
      %46 = vector.shape_cast %45 : vector<1xf32> to vector<1x1x1xf32>
      %47 = vector.extract %46[0, 0, 0] : f32 from vector<1x1x1xf32>
      %48 = vector.broadcast %47 : f32 to vector<1x1xf32>
      %49 = vector.broadcast %48 : vector<1x1xf32> to vector<8x128xf32>
      %50 = arith.addf %43, %49 : vector<8x128xf32>
      %c0_19 = arith.constant 0 : index
      %c0_20 = arith.constant 0 : index
      %51 = vector.load %arg5[%c0_19, %c0_20] : memref<8x128xf32, #tpu.memory_space<vmem>>, vector<8x128xf32>
      tpu.vector_store %arg5[%c0_19, %c0_20], %50 {strides = array<i32>} : memref<8x128xf32, #tpu.memory_space<vmem>>, vector<8x128xf32>,
    } else {
    }
    %true = arith.constant true
    %32 = arith.xori %29, %true : i1
    %33 = arith.extui %32 : i1 to i32
    %c0_i32_12 = arith.constant 0 : i32
    %34 = arith.cmpi ne, %33, %c0_i32_12 : i32
    scf.if %34 {
      %c0_13 = arith.constant 0 : index
      %c0_14 = arith.constant 0 : index
      %35 = vector.load %arg5[%c0_13, %c0_14] : memref<8x128xf32, #tpu.memory_space<vmem>>, vector<8x128xf32>
      %36 = vector.shape_cast %24 : vector<8x1xf32> to vector<1x8x1xf32>
      %cst_15 = arith.constant dense<0.000000e+00> : vector<1xf32>
      %37 = vector.multi_reduction <add>, %36, %cst_15 [1, 2] : vector<1x8x1xf32> to vector<1xf32>
      %38 = vector.shape_cast %37 : vector<1xf32> to vector<1x1x1xf32>
      %39 = vector.extract %38[0, 0, 0] : f32 from vector<1x1x1xf32>
      %40 = vector.broadcast %39 : f32 to vector<1x1xf32>
      %41 = vector.broadcast %40 : vector<1x1xf32> to vector<8x128xf32>
      %42 = arith.addf %35, %41 : vector<8x128xf32>
      %c0_16 = arith.constant 0 : index
      %c0_17 = arith.constant 0 : index
      %43 = vector.load %arg5[%c0_16, %c0_17] : memref<8x128xf32, #tpu.memory_space<vmem>>, vector<8x128xf32>
      tpu.vector_store %arg5[%c0_16, %c0_17], %42 {strides = array<i32>} : memref<8x128xf32, #tpu.memory_space<vmem>>, vector<8x128xf32>,
    } else {
    }
    return
  }
  func.func @transform_0(%arg0: i32, %arg1: i32) -> (i32, i32) {
    %c0_i32 = arith.constant 0 : i32
    %c0_i32_0 = arith.constant 0 : i32
    return %arg1, %c0_i32 : i32, i32
  }
  func.func @transform_1(%arg0: i32, %arg1: i32) -> (i32, i32) {
    %c0_i32 = arith.constant 0 : i32
    %c0_i32_0 = arith.constant 0 : i32
    return %arg1, %c0_i32 : i32, i32
  }
  func.func @transform_2(%arg0: i32, %arg1: i32) -> (i32, i32) {
    %c0_i32 = arith.constant 0 : i32
    %c0_i32_0 = arith.constant 0 : i32
    return %arg1, %c0_i32 : i32, i32
  }
  func.func @transform_3(%arg0: i32, %arg1: i32) -> (i32, i32) {
    %c0_i32 = arith.constant 0 : i32
    %c0_i32_0 = arith.constant 0 : i32
    return %arg0, %c0_i32 : i32, i32
  }
}

</mosaic_0001>

<bundles_post_ra>
// kernel: tpu_custom_call.1
= control target key start
LH: loop header
LB: loop body
LE: loop exit
PB: predicated region body
PF: predicated region fallthrough
CT: control target
= control target key end

     0   :  { %8 = vsyncpa [#allocation3], 0  ;;  %s985_s0 = inlined_call_operand.hbm [shape: f32[32,128], index: 0, kind: input, shape index: {}]   ;;  %s986_s1 = inlined_call_operand.hbm [shape: f32[32,128], index: 1, kind: input, shape index: {}]   ;;  %s987_s2 = inlined_call_operand.hbm [shape: f32[32,128], index: 2, kind: input, shape index: {}]   ;;  %s988_s3 = inlined_call_operand.hbm [shape: f32[8,128], index: 3, kind: output, shape index: {}]  }
   0x1   :  { %10 = vsyncpa [#allocation3 + $0x1], 0 }
   0x2   :  { %11 = vsyncpa [#allocation6], 0 }
   0x3   :  { %13 = vsyncpa [#allocation6 + $0x1], 0 }
   0x4   :  { %14 = vsyncpa [#allocation4], 0  ;;  %s765_s12 = smov 0   ;;  %s767_s13 = smov 0  }
   0x5   :  { %s769_s14 = smov 0   ;;  %s771_s15 = smov 0  }
   0x6   :  { %s773_s16 = smov 0   ;;  %s775_s17 = smov 0  }
   0x7 LB: > { %s794_s18 = sadd.s32 4294967295, %s738_s17   ;;  %s29_s19 = sadd.s32 1, %s734_s16  ;;  %s738_s17 = sphi %s775_s17, %s20_s17   ;;  %s734_s16 = sphi %s773_s16, %s1005_s16   ;;  %s730_s15 = sphi %s771_s15, %s1004_s15   ;;  %s726_s14 = sphi %s769_s14, %s1003_s14   ;;  %s722_s13 = sphi %s767_s13, %s1002_s13   ;;  %s718_s12 = sphi %s765_s12, %s1001_s12  }
   0x8   : > { %p30_p0 = scmp.ge.s32.totalorder %s29_s19, 4  ;;  %s39_s20 = sadd.s32 1, %s726_s14 }
   0x9   : > { %p46_p1 = scmp.ne.s32.totalorder %s726_s14, %s722_s13  ;;  %p47_p2 = scmp.eq.s32.totalorder %s738_s17, 0 }
   0xa   : > { %s1007_s19 = smov (%p30_p0, %s29_s19), 0  ;;  %p52_p4 = scmp.ne.s32.totalorder %s722_s13, %s718_s12 }
   0xb   : > { %p48_p3 = por %p47_p2, %p46_p1  ;;  %s36_s21 = ssub.s32 %s734_s16, %s1007_s19 }
   0xc   : > { %p53_p5 = scmp.eq.s32.totalorder %s794_s18, 0  ;;  %p37_p6 = scmp.eq.s32.totalorder %s36_s21, 0 }
   0xd   : > { %p507_p8 = scmp.lt.s32.totalorder %s738_s17, 4  ;;  %s154_s24 = sand.u32 1, %s726_s14  }
   0xe   : > { %p807_p7 = por %p53_p5, %p52_p4  ;;  %s817_s25 = sshll.u32 %s734_s16, 7 }
   0xf   : > { %s813_s23 = scalar_select %p37_p6, %s726_s14, %s39_s20  }
  0x10   : > { %s992_s22 = scalar_select %p807_p7, 1, 0 }
  0x11   : > { %s821_s26 = sshll.u32 %s154_s24, 3  ;;  %p823_p9 = pnand %p507_p8, %p48_p3 }
  0x12   : > { %s172_s28 = sand.u32 1, %s738_s17   ;;  %s832_s4 = scalar_lea.hbm %s986_s1, %s817_s25 }
  0x13   : > { %s993_s27 = scalar_select %p823_p9, 1, 0 }
  0x14   : > { %s176_s5 = scalar_lea.vmem [#allocation5], %s821_s26  ;;  %s838_s7 = scalar_lea.sflag [#allocation6], %s172_s28 }
  0x15   : > { %s183_s6 = sshll.u32 %s176_s5, 4  ;;  %s564_s8 = scalar_lea.hbm %s832_s4, 128  ;;  %s835_s6 = int_to_ptr.vmem [resolvable:$true] %s183_s6 }
  0x16   : > { %p565_p11 = scmp.ne.s32.totalorder %s832_s4, %s564_s8  ;;  %p844_p12 = pneg %p823_p9 }
  0x17   : > { %s569_s12 = scalar_lea.hbm %s986_s1, 512  ;;  %p570_p1 = scmp.lt.u32.totalorder %s832_s4, %s986_s1 }
  0x18   : > { %p567_p13 = pnand %p844_p12, %p565_p11  ;;  %p571_p2 = scmp.lt.u32.totalorder %s569_s12, %s564_s8 }
  0x19   : > { %p573_p4 = scmp.lt.u32.totalorder %s564_s8, %s832_s4 }
  0x1a   : > { %p568_p0 = pneg %p567_p13  ;;  %p572_p3 = por %p571_p2, %p570_p1 }
  0x1c   : > { %p574_p5 = por %p573_p4, %p572_p3 }
  0x1e   : > { %p575_p6 = pnand %p574_p5, %p568_p0 }
  0x20   : > { %578 = shalt.err (!%p575_p6)
}
  0x21   : > { %s579_s28 = scalar_lea.vmem %s835_s6, 128  ;;  %s740_s29 = smov [#allocation5]  }
  0x22   : > { %p580_p8 = scmp.ne.s32.totalorder %s835_s6, %s579_s28  ;;  %s584_s30 = sshll.u32 %s740_s29, 4  ;;  %s585_s30 = int_to_ptr.vmem [resolvable:$false] %s584_s30 }
  0x23   : > { %s586_s5 = scalar_lea.vmem %s585_s30, 256  ;;  %p587_p10 = scmp.lt.s32.totalorder %s835_s6, %s585_s30 }
  0x24   : > { %p582_p11 = pnand %p580_p8, %p844_p12  ;;  %p588_p7 = scmp.lt.s32.totalorder %s586_s5, %s579_s28 }
  0x26   : > { %p583_p13 = pneg %p582_p11  ;;  %p589_p1 = por %p588_p7, %p587_p10 }
  0x28   : > { %p590_p2 = pnand %p589_p1, %p583_p13 }
  0x2a   : > { %593 = shalt.err (!%p590_p2)
}
  0x2b   : > { %503 = dma.hbm_to_vmem [thread:$0]  (!%p823_p9), %s832_s4, 128, %s835_s6, %s838_s7  }
  0x2c   : > { %p206_p0 = scmp.lt.s32.totalorder %s738_s17, 5  ;;  %p995_p3 = scmp.ge.s32.totalorder %s738_s17, 1 }
  0x2d   : > { %s879_s12 = scalar_lea.hbm %s985_s0, %s817_s25  ;;  %s158_s20 = scalar_lea.vmem [#allocation2], %s821_s26 }
  0x2e   : > { %p871_p4 = pnand %p995_p3, %p206_p0  ;;  %s165_s21 = sshll.u32 %s158_s20, 4  ;;  %s166_s21 = int_to_ptr.vmem [resolvable:$true] %s165_s21 }
  0x2f   : > { %s155_s4 = scalar_lea.sflag [#allocation3], %s154_s24  ;;  %s594_s6 = scalar_lea.hbm %s879_s12, 128 }
  0x30   : > { %s996_s8 = scalar_select %p871_p4, 1, 0 }
  0x31   : > { %p595_p7 = scmp.ne.s32.totalorder %s879_s12, %s594_s6  ;;  %s599_s30 = scalar_lea.hbm %s985_s0, 512 }
  0x32   : > { %p600_p6 = scmp.lt.u32.totalorder %s879_s12, %s985_s0  ;;  %p601_p8 = scmp.lt.u32.totalorder %s599_s30, %s594_s6 }
  0x33   : > { %p597_p10 = pnand %p595_p7, %p844_p12  ;;  %p603_p13 = scmp.lt.u32.totalorder %s594_s6, %s879_s12 }
  0x34   : > { %p602_p11 = por %p601_p8, %p600_p6 }
  0x35   : > { %p598_p5 = pneg %p597_p10 }
  0x36   : > { %p604_p1 = por %p603_p13, %p602_p11 }
  0x38   : > { %p605_p2 = pnand %p604_p1, %p598_p5 }
  0x3a   : > { %608 = shalt.err (!%p605_p2)
}
  0x3b   : > { %s609_s24 = scalar_lea.vmem %s166_s21, 128  ;;  %s741_s11 = smov [#allocation2]  }
  0x3c   : > { %p610_p0 = scmp.ne.s32.totalorder %s166_s21, %s609_s24  ;;  %s614_s20 = sshll.u32 %s741_s11, 4  ;;  %s615_s20 = int_to_ptr.vmem [resolvable:$false] %s614_s20 }
  0x3d   : > { %s616_s28 = scalar_lea.vmem %s615_s20, 256  ;;  %p617_p10 = scmp.lt.s32.totalorder %s166_s21, %s615_s20 }
  0x3e   : > { %p612_p3 = pnand %p610_p0, %p844_p12  ;;  %p618_p4 = scmp.lt.s32.totalorder %s616_s28, %s609_s24 }
  0x40   : > { %p613_p7 = pneg %p612_p3  ;;  %p619_p9 = por %p618_p4, %p617_p10 }
  0x42   : > { %p620_p6 = pnand %p619_p9, %p613_p7 }
  0x44   : > { %623 = shalt.err (!%p620_p6)
}
  0x45   : > { %p997_p8 = scmp.ne.s32.totalorder %s993_s27, 0  ;;  %s905_s30 = scalar_lea.hbm %s987_s2, %s817_s25 }
  0x46   : > { %s194_s5 = scalar_lea.vmem [#allocation7], %s821_s26  ;;  %s624_s24 = scalar_lea.hbm %s905_s30, 128 }
  0x47   : > { %500 = dma.hbm_to_vmem [thread:$0]  (!%p997_p8), %s879_s12, 128, %s166_s21, %s155_s4  }
  0x48   : > { %s201_s10 = sshll.u32 %s194_s5, 4  ;;  %p625_p9 = scmp.ne.s32.totalorder %s905_s30, %s624_s24  ;;  %s202_s10 = int_to_ptr.vmem [resolvable:$true] %s201_s10 }
  0x49   : > { %s629_s12 = scalar_lea.hbm %s987_s2, 512  ;;  %p630_p11 = scmp.lt.u32.totalorder %s905_s30, %s987_s2 }
  0x4a   : > { %p627_p4 = pnand %p625_p9, %p844_p12  ;;  %p631_p13 = scmp.lt.u32.totalorder %s629_s12, %s624_s24 }
  0x4b   : > { %p633_p2 = scmp.lt.u32.totalorder %s624_s24, %s905_s30 }
  0x4c   : > { %p628_p5 = pneg %p627_p4  ;;  %p632_p1 = por %p631_p13, %p630_p11 }
  0x4e   : > { %p634_p0 = por %p633_p2, %p632_p1 }
  0x50   : > { %p635_p3 = pnand %p634_p0, %p628_p5 }
  0x52   : > { %638 = shalt.err (!%p635_p3)
}
  0x53   : > { %s639_s25 = scalar_lea.vmem %s202_s10, 128  ;;  %s742_s26 = smov [#allocation7]  }
  0x54   : > { %p640_p7 = scmp.ne.s32.totalorder %s202_s10, %s639_s25  ;;  %s644_s28 = sshll.u32 %s742_s26, 4  ;;  %s645_s28 = int_to_ptr.vmem [resolvable:$false] %s644_s28 }
  0x55   : > { %s646_s6 = scalar_lea.vmem %s645_s28, 256  ;;  %p647_p9 = scmp.lt.s32.totalorder %s202_s10, %s645_s28 }
  0x56   : > { %p642_p10 = pnand %p640_p7, %p844_p12  ;;  %p648_p4 = scmp.lt.s32.totalorder %s646_s6, %s639_s25 }
  0x58   : > { %p643_p6 = pneg %p642_p10  ;;  %p649_p8 = por %p648_p4, %p647_p9 }
  0x5a   : > { %p650_p11 = pnand %p649_p8, %p643_p6 }
  0x5c   : > { %653 = shalt.err (!%p650_p11)
}
  0x5d   : > { %p998_p13 = scmp.ne.s32.totalorder %s993_s27, 0  ;;  %p999_p5 = scmp.ne.s32.totalorder %s996_s8, 0 }
  0x5e   : > { %s212_s9 = sand.u32 (!%p999_p5), 1, %s722_s13   ;;  %p1000_p12 = scmp.ne.s32.totalorder (!%p999_p5), %s992_s22, 0 }
  0x5f   : > { %506 = dma.hbm_to_vmem [thread:$0]  (!%p998_p13), %s905_s30, 128, %s202_s10, %s838_s7  }
  0x60   : > { %210 = sbr.rel (%p999_p5) target bundleno = 736 (0x2e0), region = 32  ;;  %s469_s29 = sshll.u32 (!%p999_p5), %s212_s9, 3 }
  0x61   : > { %s213_s5 = scalar_lea.sflag (!%p999_p5), [#allocation3], %s212_s9  ;;  %s216_s24 = scalar_lea.vmem (!%p999_p5), [#allocation2], %s469_s29 }
  0x67   : > { %705 = dma.done.wait (%p1000_p12), %s213_s5, 128  }
  0x68   : > { %707 = vsyncadd (%p1000_p12), %s213_s5, 4294967168  ;;  %s221_s27 = sand.u32 1, %s794_s18   ;;  %s225_s20 = scalar_lea.vmem [#allocation5], %s469_s29 }
  0x69   : > { %s222_s11 = scalar_lea.sflag [#allocation6], %s221_s27 }
  0x6a   : > { %709 = dma.done.wait (%p1000_p12), %s222_s11, 256  }
  0x6b   : > { %711 = vsyncadd (%p1000_p12), %s222_s11, 4294967040  ;;  %s234_s7 = scalar_lea.vmem [#allocation7], %s469_s29  ;;  %p472_p8 = scmp.ne.s32.totalorder %s730_s15, 0 }
  0x6c   : > { %v743_v0 = vmov (!%p472_p8), 0.0  }
  0x6d   : > { %265 = sbr.rel (%p472_p8) target bundleno = 116 (0x74), region = 48  ;;  %266 = vst [vmem:[#allocation8] sm:$0xff] (!%p472_p8), %v743_v0 }
  0x74 PF: > { %v267_v1 = vld [vmem:[%s216_s24] sm:$0xff]  ;;  %v268_v2 = vld [vmem:[%s225_s20] sm:$0xff]  ;;  %s481_s22 = sshll.u32 %s730_s15, 3 }
  0x75   : > { %v269_v3 = vld [vmem:[%s234_s7] sm:$0xff]  ;;  %v270_v4 = vsub.f32 %v267_v1, %v268_v2  ;;  %s940_s8 = sadd.s32 8, %s481_s22 }
  0x76   : > { %v272_v5 = vsub.f32 %v267_v1, %v269_v3  ;;  %p474_p1 = scmp.le.s32.totalorder %s940_s8, 32 }
  0x77   : > { %v271_v6 = vadd.f32 1e-06, %v270_v4  ;;  %v306_v25 = vlaneseq (!%p474_p1)  ;;  %v308_v26 = vstv (!%p474_p1), %s481_s22  ;;  %vm313_vm4 = vcmask (!%p474_p1), 7168   ;;  %v312_v38 = vld [vmem:[#allocation8] sm:$0xff] (!%p474_p1) }
  0x78   : > { %v273_v7 = vadd.f32 1e-06, %v272_v5 }
  0x79   : > { %v274_v8 = vmul.f32 %v271_v6, %v271_v6  ;;  %v307_v27 = vshrl.u32 (!%p474_p1), %v306_v25, 7 }
  0x7a   : > { %v284_v9 = vmul.f32 %v273_v7, %v273_v7 }
  0x7b   : > { %275 = vadd.xlane.f32.xlu0 %v274_v8  ;;  %v309_v28 = vadd.s32 (!%p474_p1), %v308_v26, %v307_v27 }
  0x7d   : > { %vm310_vm5 = vcmp.lt.s32.totalorder (!%p474_p1), %v309_v28, 32 }
  0x7f   : > { %285 = vadd.xlane.f32.xlu0 %v284_v9 }
 0x108   : > { %v276_v10 = vpop.xlane.xlu0 %275 }
 0x109   : > { %560 = vrsqrt.f32 %v276_v10  ;;  %vm279_vm0 = vcmp.eq.f32.partialorder %v276_v10, inf  ;;  %v282_v17 = vand.u32 2147483648, %v276_v10  ;;  %vm281_vm2 = vcmp.eq.f32.partialorder %v276_v10, 0.0 }
 0x10c   : > { %v286_v11 = vpop.xlane.xlu0 %285 }
 0x10d   : > { %562 = vrsqrt.f32 %v286_v11  ;;  %vm289_vm1 = vcmp.eq.f32.partialorder %v286_v11, inf  ;;  %v292_v18 = vand.u32 2147483648, %v286_v11  ;;  %vm291_vm3 = vcmp.eq.f32.partialorder %v286_v11, 0.0 }
 0x113   : > { %v561_v12 = vpop.eup %560 }
 0x114   : > { %v278_v13 = vmul.f32 %v561_v12, %v276_v10 }
 0x116   : > { %v280_v15 = vsel %vm279_vm0, %v276_v10, %v278_v13 }
 0x117   : > { %v563_v14 = vpop.eup %562  ;;  %v283_v20 = vsel %vm281_vm2, %v282_v17, %v280_v15 }
 0x118   : > { %v288_v16 = vmul.f32 %v563_v14, %v286_v11 }
 0x11a   : > { %v290_v19 = vsel %vm289_vm1, %v286_v11, %v288_v16  ;;  %304 = sbr.rel (%p474_p1) target bundleno = 500 (0x1f4), region = 52 }
 0x11b   : > { %v293_v21 = vsel %vm291_vm3, %v292_v18, %v290_v19 }
 0x11c   : > { %v294_v22 = vsub.f32 %v283_v20, %v293_v21 }
 0x11e   : > { %v295_v23 = vadd.f32 1.0, %v294_v22 }
 0x120   : > { %v296_v24 = vmax.f32 %v295_v23, 0.0 }
 0x122   : > { %v311_v29 = vsel %vm310_vm5, %v296_v24, 0.0 }
 0x123   : > { %v314_v30 = vsel %vm313_vm4, %v311_v29, 0.0 }
 0x124   : > { %315 = vadd.xlane.f32.xlu0 %v314_v30 }
 0x1b1   : > { %v316_v31 = vpop.xlane.xlu0 %315 }
 0x1b2   : > { %v317_v32 = vrot.slane %v316_v31, 4 }
 0x1b4   : > { %v318_v33 = vadd.f32 %v317_v32, %v316_v31 }
 0x1b6   : > { %v319_v34 = vrot.slane %v318_v33, 2 }
 0x1b8   : > { %v320_v35 = vadd.f32 %v319_v34, %v318_v33 }
 0x1ba   : > { %v321_v36 = vrot.slane %v320_v35, 1 }
 0x1bc   : > { %v322_v37 = vadd.f32 %v321_v36, %v320_v35 }
 0x1be   : > { %483 = vpush %v322_v37 }
 0x1ef   : > { %s484_s15 = spop %483 }
 0x1f0   : > { %v324_v39 = vstv %s484_s15 }
 0x1f1   : > { %v325_v40 = vadd.f32 %v324_v39, %v312_v38 }
 0x1f3   : > { %326 = vst [vmem:[#allocation8] sm:$0xff] %v325_v40 }
 0x1f4 PF: > { %p476_p2 = scmp.gt.s32.totalorder %s940_s8, 32 }
 0x1f5   : > { %vm332_vm6 = vcmask (!%p476_p2), 7168  }
 0x1f6   : > { %330 = sbr.rel (%p476_p2) target bundleno = 711 (0x2c7), region = 56  ;;  %v333_v41 = vsel (!%p476_p2), %vm332_vm6, %v296_v24, 0.0 }
 0x1f7   : > { %334 = vadd.xlane.f32.xlu0 (!%p476_p2), %v333_v41 }
 0x1fa   : > { %v331_v49 = vld [vmem:[#allocation8] sm:$0xff] (!%p476_p2) }
 0x284   : > { %v335_v42 = vpop.xlane.xlu0 %334 }
 0x285   : > { %v336_v43 = vrot.slane %v335_v42, 4 }
 0x287   : > { %v337_v44 = vadd.f32 %v336_v43, %v335_v42 }
 0x289   : > { %v338_v45 = vrot.slane %v337_v44, 2 }
 0x28b   : > { %v339_v46 = vadd.f32 %v338_v45, %v337_v44 }
 0x28d   : > { %v340_v47 = vrot.slane %v339_v46, 1 }
 0x28f   : > { %v341_v48 = vadd.f32 %v340_v47, %v339_v46 }
 0x291   : > { %485 = vpush %v341_v48 }
 0x2c2   : > { %s486_s30 = spop %485 }
 0x2c3   : > { %v343_v50 = vstv %s486_s30 }
 0x2c4   : > { %v344_v51 = vadd.f32 %v343_v50, %v331_v49 }
 0x2c6   : > { %345 = vst [vmem:[#allocation8] sm:$0xff] %v344_v51 }
 0x2c7 PF: > { %p508_p0 = scmp.eq.s32.totalorder %s794_s18, 3  ;;  %s744_s10 = smov [#allocation8]  }
 0x2c8   : > { %s355_s12 = sshll.u32 %s744_s10, 4  ;;  %s356_s12 = int_to_ptr.vmem [resolvable:$true] %s355_s12 }
 0x2c9   : > { %s654_s21 = scalar_lea.vmem %s356_s12, 128  ;;  %p661_p6 = scmp.lt.s32.totalorder %s356_s12, %s356_s12 }
 0x2ca   : > { %p655_p3 = scmp.ne.s32.totalorder %s356_s12, %s654_s21  ;;  %p662_p9 = scmp.lt.s32.totalorder %s654_s21, %s654_s21 }
 0x2cc   : > { %p656_p7 = pnand %p655_p3, %p508_p0  ;;  %p663_p4 = por %p662_p9, %p661_p6 }
 0x2ce   : > { %p657_p10 = pneg %p656_p7 }
 0x2d0   : > { %p664_p11 = pnand %p663_p4, %p657_p10 }
 0x2d2   : > { %667 = shalt.err (!%p664_p11)
}
 0x2d3   : > { %s668_s26 = scalar_lea.hbm %s988_s3, 128 }
 0x2d4   : > { %p669_p13 = scmp.ne.s32.totalorder %s988_s3, %s668_s26  ;;  %p674_p8 = scmp.lt.u32.totalorder %s668_s26, %s988_s3 }
 0x2d6   : > { %p670_p5 = pnand %p669_p13, %p508_p0 }
 0x2d8   : > { %p671_p12 = pneg %p670_p5 }
 0x2da   : > { %p676_p1 = pnand %p674_p8, %p671_p12 }
 0x2dc   : > { %679 = shalt.err (!%p676_p1)
}
 0x2dd   : > { %494 = dma.vmem_to_hbm [thread:$0]  (%p508_p0), %s356_s12, 128, %s988_s3, [#allocation4]  }
 0x2de   : > { %713 = dma.done.wait (%p508_p0), [#allocation4], 128  }
 0x2df   : > { %715 = vsyncadd (%p508_p0), [#allocation4], 4294967168 }
 0x2e0 PF: > { %s20_s17 = sadd.s32 1, %s738_s17   ;;  %s1001_s12 = smov %s722_s13 }
 0x2e1   : > { %p17_p2 = scmp.ge.s32.totalorder %s20_s17, 6   ;;  %s1002_s13 = smov %s726_s14 }
 0x2e2   : > { %s1003_s14 = smov %s813_s23  ;;  %s1004_s15 = smov %s734_s16 }
 0x2e3   : > { %s1005_s16 = smov %s1007_s19  ;;  %19 = sbr.rel (!%p17_p2) target bundleno = 7 (0x7), region = 106 }
 0x2ea   :  { %368 = vsyncpa [#allocation3], 1 }
 0x2eb   :  { %370 = vsyncpa [#allocation3 + $0x1], 1 }
 0x2ec   :  { %371 = vsyncpa [#allocation6], 1 }
 0x2ed   :  { %373 = vsyncpa [#allocation6 + $0x1], 1 }
 0x2ee   :  { %374 = vsyncpa [#allocation4], 1 }
 0x2ef   :  { %376 = vsyncpa [#allocation4 + $0x1], 1 }

</bundles_post_ra>
